<compile_context>
chip_gen: v7x
topology: tpu7x:2x2x1
jax: 0.10.0
libtpu: 0.0.40
codegen_flags: <defaults>
</compile_context>

<pallas_src>
import math

import jax
import jax.numpy as jnp
from jax.experimental import pallas as pl
from jax.experimental.pallas import tpu as pltpu


def _gamma_intersection_kernel(alpha_ref, beta_ref, w1a_ref, w1b_ref, b1_ref,
                               w2_ref, b2_ref, out_a_ref, out_b_ref):
    N, Bt, D = alpha_ref.shape
    D2 = 2 * D

    alpha = alpha_ref[...].astype(jnp.float32)            # (N, Bt, D)
    beta = beta_ref[...].astype(jnp.float32)              # (N, Bt, D)
    a2d = alpha.reshape(N * Bt, D)
    b2d = beta.reshape(N * Bt, D)

    # Fused layer 1 for both branches (flop-neutral fusion):
    #   relu([alpha|beta] @ [wa1|wb1] + [ba1|bb1])
    # = relu(alpha @ W1_top + beta @ W1_bot + b1)          -> (N*Bt, 2D)
    h = jnp.dot(a2d, w1a_ref[...], preferred_element_type=jnp.float32)
    h = h + jnp.dot(b2d, w1b_ref[...], preferred_element_type=jnp.float32)
    h = jnp.maximum(h + b1_ref[...], 0.0)

    if len(w2_ref.shape) == 2:
        # Small-D path: block-diagonal fused W2 (2D, 2D).  Better lane
        # utilization while 2D fits in one MXU tile; softmax / weighted sum
        # run on one lane-denser (N, Bt, 2D) slab.
        logits = jnp.dot(h, w2_ref[...], preferred_element_type=jnp.float32)
        logits = (logits + b2_ref[...]).reshape(N, Bt, D2)
        m = jnp.max(logits, axis=0, keepdims=True)          # softmax over N
        e = jnp.exp(logits - m)
        inv = pl.reciprocal(jnp.sum(e, axis=0, keepdims=True), approx=False)
        att = e * inv
        out_a_ref[...] = jnp.sum(att[:, :, :D] * alpha, axis=0).astype(out_a_ref.dtype)
        out_b_ref[...] = jnp.sum(att[:, :, D:] * beta, axis=0).astype(out_b_ref.dtype)
    else:
        # Large-D path: w2_ref is (2, D, D); two DxD dots on the lane halves
        # of h — no stored zeros, so half the layer-2 MXU work / W2 bytes.
        b2 = b2_ref[...]
        for half, (x, out_ref) in enumerate(((alpha, out_a_ref),
                                             (beta, out_b_ref))):
            hh = h[:, half * D:(half + 1) * D]
            logits = jnp.dot(hh, w2_ref[half], preferred_element_type=jnp.float32)
            logits = (logits + b2[:, half * D:(half + 1) * D]).reshape(N, Bt, D)
            m = jnp.max(logits, axis=0, keepdims=True)       # softmax over N
            e = jnp.exp(logits - m)
            inv = pl.reciprocal(jnp.sum(e, axis=0, keepdims=True), approx=False)
            out_ref[...] = jnp.sum((e * inv) * x, axis=0).astype(out_ref.dtype)


def pack_params(p, *, mxu_lane_width=128):
    """Pack the 4 Linear layers into fused kernel weights (done once).

    Layer 1 stays fused across branches (flop-neutral) but W1 is split by
    input rows so the kernel consumes alpha / beta directly:
        [alpha|beta] @ [wa1|wb1] == alpha @ w1a + beta @ w1b.
    Layer 2 is only block-diag fused while 2D fits in one MXU lane tile;
    otherwise the zeros would double layer-2 MXU time and W2 bytes.
    """
    D = p["wa2"].shape[0]
    w1 = jnp.concatenate([p["wa1"], p["wb1"]], axis=1)       # (2D, 2D)
    packed = {
        "w1a": w1[:D, :],                                    # rows multiplying alpha
        "w1b": w1[D:, :],                                    # rows multiplying beta
        "b1": jnp.concatenate([p["ba1"], p["bb1"]], axis=1), # (1, 2D)
        "b2": jnp.concatenate([p["ba2"], p["bb2"]], axis=1), # (1, 2D)
    }
    if 2 * D <= mxu_lane_width:
        zeros = jnp.zeros((D, D), jnp.float32)
        packed["w2"] = jnp.concatenate(
            [jnp.concatenate([p["wa2"], zeros], axis=1),
             jnp.concatenate([zeros, p["wb2"]], axis=1)], axis=0)   # (2D, 2D)
    else:
        packed["w2"] = jnp.stack([p["wa2"], p["wb2"]], axis=0)       # (2, D, D)
    return packed


def _vmem_capacity_bytes():
    # Generation-aware: 128 MiB on v5e/v6e, 64 MiB per TensorCore on v7x.
    try:
        return int(pltpu.get_tpu_info().vmem_capacity_bytes)
    except Exception:
        return 64 * 1024 * 1024          # conservative (v7x-sized) fallback


def _pick_block_b(B, N, D, fuse_w2, budget_bytes):
    """Largest 8-aligned batch tile that fits the VMEM budget."""
    f32 = 4
    d2 = 2 * D
    # Resident weights/biases (counted once; single-buffered when supported).
    fixed = f32 * (2 * D * d2 + (d2 * d2 if fuse_w2 else 2 * D * D) + 2 * d2)
    # Per-bt-row bytes: double-buffered alpha/beta input blocks, double-
    # buffered outputs, and ~5 live f32 (N, bt, 2D)-shaped intermediates.
    per_bt = f32 * (2 * 2 * N * D + 2 * 2 * D + 5 * N * d2)
    bt = (budget_bytes - fixed) // per_bt
    bt = max(8, (bt // 8) * 8)
    bt = min(bt, 1024)                   # per-step overhead amortized by here
    if B <= bt:
        # Whole batch fits in one step.  Split in two (v7x megacore: one step
        # per TensorCore) whenever both halves stay 8-aligned.
        if B >= 16 and B % 16 == 0:
            return B // 2
        return B
    # Prefer an 8-aligned divisor of B (no ragged tail); else ragged cdiv tiles.
    for cand in range(bt, 7, -8):
        if B % cand == 0:
            return cand
    return bt


def gamma_intersection(alpha_embeddings, beta_embeddings, packed):
    N, B, D = alpha_embeddings.shape
    D2 = 2 * D
    fuse_w2 = packed["w2"].ndim == 2
    w2_shape = packed["w2"].shape

    vmem_cap = _vmem_capacity_bytes()
    # ~48 MiB on v7x (64 MiB/TC), ~96 MiB on v5e/v6e (128 MiB physical).
    vmem_limit = min(int(vmem_cap * 0.75), 100 * 1024 * 1024)
    bt = _pick_block_b(B, N, D, fuse_w2, budget_bytes=int(vmem_cap * 0.55))
    grid = (pl.cdiv(B, bt),)

    layer2_flops = (2 * N * B * D2 * D2) if fuse_w2 else (2 * 2 * N * B * D * D)
    cost = pl.CostEstimate(
        flops=2 * 2 * N * B * D * D2 + layer2_flops,
        transcendentals=N * B * D2,
        bytes_accessed=4 * (2 * N * B * D + 2 * D * D2 + packed["w2"].size
                            + 2 * D2 + 2 * B * D),
    )

    def run(single_buffer_weights):
        # Resident operands: constant index_map; single-buffer when supported.
        wkw = {"pipeline_mode": pl.Buffered(1)} if single_buffer_weights else {}
        in_specs = [
            pl.BlockSpec((N, bt, D), lambda b: (0, b, 0)),            # alpha
            pl.BlockSpec((N, bt, D), lambda b: (0, b, 0)),            # beta
            pl.BlockSpec((D, D2), lambda b: (0, 0), **wkw),           # W1 top
            pl.BlockSpec((D, D2), lambda b: (0, 0), **wkw),           # W1 bottom
            pl.BlockSpec((1, D2), lambda b: (0, 0), **wkw),           # b1
            pl.BlockSpec(w2_shape, lambda b: (0,) * len(w2_shape), **wkw),  # W2
            pl.BlockSpec((1, D2), lambda b: (0, 0), **wkw),           # b2
        ]
        out_specs = [
            pl.BlockSpec((bt, D), lambda b: (b, 0)),                  # out alpha
            pl.BlockSpec((bt, D), lambda b: (b, 0)),                  # out beta
        ]
        return pl.pallas_call(
            _gamma_intersection_kernel,
            out_shape=(jax.ShapeDtypeStruct((B, D), alpha_embeddings.dtype),
                       jax.ShapeDtypeStruct((B, D), beta_embeddings.dtype)),
            grid_spec=pltpu.PrefetchScalarGridSpec(
                num_scalar_prefetch=0,
                grid=grid,
                in_specs=in_specs,
                out_specs=out_specs,
            ),
            compiler_params=pltpu.CompilerParams(
                dimension_semantics=("parallel",),     # megacore split on v7x
                vmem_limit_bytes=vmem_limit,
            ),
            cost_estimate=cost,
        )(alpha_embeddings, beta_embeddings,
          packed["w1a"], packed["w1b"], packed["b1"], packed["w2"], packed["b2"])

    try:
        return run(single_buffer_weights=True)
    except Exception:
        # Fallback if single-buffered (pl.Buffered(1)) resident operands are
        # rejected by this toolchain; costs one extra VMEM copy of weights.
        return run(single_buffer_weights=False)


# ---------------- parameter init (matches torch module) ----------------

def _xavier_uniform(key, out_features, in_features):
    # matches nn.init.xavier_uniform_ on a (out, in) torch weight
    bound = math.sqrt(6.0 / (in_features + out_features))
    w = jax.random.uniform(key, (out_features, in_features),
                           minval=-bound, maxval=bound, dtype=jnp.float32)
    return w.T  # pre-transpose to (in, out) for x @ W


def _linear_bias(key, in_features, out_features):
    # matches torch default Linear bias init: U(-1/sqrt(fan_in), 1/sqrt(fan_in))
    bound = 1.0 / math.sqrt(in_features)
    return jax.random.uniform(key, (1, out_features),
                              minval=-bound, maxval=bound, dtype=jnp.float32)


def init_params(key, dim):
    ks = jax.random.split(key, 8)
    return {
        "wa1": _xavier_uniform(ks[0], dim, dim * 2),   # (2D, D)
        "ba1": _linear_bias(ks[1], dim * 2, dim),      # (1, D)
        "wb1": _xavier_uniform(ks[2], dim, dim * 2),   # (2D, D)
        "bb1": _linear_bias(ks[3], dim * 2, dim),      # (1, D)
        "wa2": _xavier_uniform(ks[4], dim, dim),       # (D, D)
        "ba2": _linear_bias(ks[5], dim, dim),          # (1, D)
        "wb2": _xavier_uniform(ks[6], dim, dim),       # (D, D)
        "bb2": _linear_bias(ks[7], dim, dim),          # (1, D)
    }


def _reference(alpha, beta, p):
    all_emb = jnp.concatenate([alpha, beta], axis=-1)
    l1a = jax.nn.relu(all_emb @ p["wa1"] + p["ba1"][0])
    att1 = jax.nn.softmax(l1a @ p["wa2"] + p["ba2"][0], axis=0)
    l1b = jax.nn.relu(all_emb @ p["wb1"] + p["bb1"][0])
    att2 = jax.nn.softmax(l1b @ p["wb2"] + p["bb2"][0], axis=0)
    return jnp.sum(att1 * alpha, axis=0), jnp.sum(att2 * beta, axis=0)


if __name__ == "__main__":
    # Case 1: small D (2D <= 128) -> fused block-diagonal W2 path.
    N, B, D = 4, 8, 32  # num intersected sets, batch, embedding dim
    key = jax.random.PRNGKey(0)
    k_a, k_b, k_p = jax.random.split(key, 3)

    alpha = jax.random.uniform(k_a, (N, B, D), dtype=jnp.float32)  # gamma alpha > 0
    beta = jax.random.uniform(k_b, (N, B, D), dtype=jnp.float32)   # gamma beta > 0
    params = init_params(k_p, D)
    packed = pack_params(params)

    out_alpha, out_beta = gamma_intersection(alpha, beta, packed)
    jax.block_until_ready((out_alpha, out_beta))

    ref_alpha, ref_beta = _reference(alpha, beta, params)
    assert out_alpha.shape == (B, D) and out_beta.shape == (B, D)
    assert jnp.allclose(out_alpha, ref_alpha, atol=1e-5, rtol=1e-5)
    assert jnp.allclose(out_beta, ref_beta, atol=1e-5, rtol=1e-5)

    # Case 2: 2D > 128 -> split-W2 path, 2-step pipelined grid (megacore split).
    N2, B2, Dl = 3, 16, 128
    ka2, kb2, kp2 = jax.random.split(jax.random.PRNGKey(1), 3)
    alpha2 = jax.random.uniform(ka2, (N2, B2, Dl), dtype=jnp.float32)
    beta2 = jax.random.uniform(kb2, (N2, B2, Dl), dtype=jnp.float32)
    params2 = init_params(kp2, Dl)
    packed2 = pack_params(params2)

    oa2, ob2 = gamma_intersection(alpha2, beta2, packed2)
    jax.block_until_ready((oa2, ob2))

    ra2, rb2 = _reference(alpha2, beta2, params2)
    assert oa2.shape == (B2, Dl) and ob2.shape == (B2, Dl)
    assert jnp.allclose(oa2, ra2, atol=1e-5, rtol=1e-5)
    assert jnp.allclose(ob2, rb2, atol=1e-5, rtol=1e-5)

    print("KERNEL_OK")
</pallas_src>

<mosaic_0001>
module attributes {stable_mosaic.version = 11 : i64} {
  func.func @_gamma_intersection_kernel(%arg0: i32, %arg1: memref<4x8x32xf32, #tpu.memory_space<vmem>>, %arg2: memref<4x8x32xf32, #tpu.memory_space<vmem>>, %arg3: memref<32x64xf32, #tpu.memory_space<vmem>>, %arg4: memref<32x64xf32, #tpu.memory_space<vmem>>, %arg5: memref<1x64xf32, #tpu.memory_space<vmem>>, %arg6: memref<64x64xf32, #tpu.memory_space<vmem>>, %arg7: memref<1x64xf32, #tpu.memory_space<vmem>>, %arg8: memref<8x32xf32, #tpu.memory_space<vmem>>, %arg9: memref<8x32xf32, #tpu.memory_space<vmem>>) attributes {dimension_semantics = [#tpu.dimension_semantics<parallel>], iteration_bounds = array<i64: 1>, scalar_prefetch = 0 : i64, scratch_operands = 0 : i64, tpu.core_type = #tpu.core_type<tc>, window_params = [{transform_indices = @transform_0, window_bounds = array<i64: 4, 8, 32>}, {transform_indices = @transform_1, window_bounds = array<i64: 4, 8, 32>}, {pipeline_mode = #tpu.pipeline_mode<synchronous>, transform_indices = @transform_2, window_bounds = array<i64: 32, 64>}, {pipeline_mode = #tpu.pipeline_mode<synchronous>, transform_indices = @transform_3, window_bounds = array<i64: 32, 64>}, {pipeline_mode = #tpu.pipeline_mode<synchronous>, transform_indices = @transform_4, window_bounds = array<i64: 1, 64>}, {pipeline_mode = #tpu.pipeline_mode<synchronous>, transform_indices = @transform_5, window_bounds = array<i64: 64, 64>}, {pipeline_mode = #tpu.pipeline_mode<synchronous>, transform_indices = @transform_6, window_bounds = array<i64: 1, 64>}, {transform_indices = @transform_7, window_bounds = array<i64: 8, 32>}, {transform_indices = @transform_8, window_bounds = array<i64: 8, 32>}]} {
    %c0 = arith.constant 0 : index
    %c0_0 = arith.constant 0 : index
    %c0_1 = arith.constant 0 : index
    %0 = vector.load %arg1[%c0, %c0_0, %c0_1] : memref<4x8x32xf32, #tpu.memory_space<vmem>>, vector<4x8x32xf32>
    %c0_2 = arith.constant 0 : index
    %c0_3 = arith.constant 0 : index
    %c0_4 = arith.constant 0 : index
    %1 = vector.load %arg2[%c0_2, %c0_3, %c0_4] : memref<4x8x32xf32, #tpu.memory_space<vmem>>, vector<4x8x32xf32>
    %2 = vector.shape_cast %0 : vector<4x8x32xf32> to vector<32x32xf32>
    %3 = vector.shape_cast %1 : vector<4x8x32xf32> to vector<32x32xf32>
    %c0_5 = arith.constant 0 : index
    %c0_6 = arith.constant 0 : index
    %4 = vector.load %arg3[%c0_5, %c0_6] : memref<32x64xf32, #tpu.memory_space<vmem>>, vector<32x64xf32>
    %cst = arith.constant dense<0.000000e+00> : vector<32x64xf32>
    %5 = tpu.matmul %2, %4, %cst {dimension_numbers = #tpu.dot_dimension_numbers<[1], [0], [0], [1], [0, 0, 1, 1], [], []>} : vector<32x32xf32>, vector<32x64xf32>, vector<32x64xf32> -> vector<32x64xf32>
    %c0_7 = arith.constant 0 : index
    %c0_8 = arith.constant 0 : index
    %6 = vector.load %arg4[%c0_7, %c0_8] : memref<32x64xf32, #tpu.memory_space<vmem>>, vector<32x64xf32>
    %cst_9 = arith.constant dense<0.000000e+00> : vector<32x64xf32>
    %7 = tpu.matmul %3, %6, %cst_9 {dimension_numbers = #tpu.dot_dimension_numbers<[1], [0], [0], [1], [0, 0, 1, 1], [], []>} : vector<32x32xf32>, vector<32x64xf32>, vector<32x64xf32> -> vector<32x64xf32>
    %8 = arith.addf %5, %7 : vector<32x64xf32>
    %c0_10 = arith.constant 0 : index
    %c0_11 = arith.constant 0 : index
    %9 = vector.load %arg5[%c0_10, %c0_11] : memref<1x64xf32, #tpu.memory_space<vmem>>, vector<1x64xf32>
    %10 = vector.broadcast %9 : vector<1x64xf32> to vector<32x64xf32>
    %11 = arith.addf %8, %10 : vector<32x64xf32>
    %cst_12 = arith.constant 0.000000e+00 : f32
    %12 = vector.broadcast %cst_12 : f32 to vector<32x64xf32>
    %13 = arith.maximumf %11, %12 : vector<32x64xf32>
    %c0_13 = arith.constant 0 : index
    %c0_14 = arith.constant 0 : index
    %14 = vector.load %arg6[%c0_13, %c0_14] : memref<64x64xf32, #tpu.memory_space<vmem>>, vector<64x64xf32>
    %cst_15 = arith.constant dense<0.000000e+00> : vector<32x64xf32>
    %15 = tpu.matmul %13, %14, %cst_15 {dimension_numbers = #tpu.dot_dimension_numbers<[1], [0], [0], [1], [0, 0, 1, 1], [], []>} : vector<32x64xf32>, vector<64x64xf32>, vector<32x64xf32> -> vector<32x64xf32>
    %c0_16 = arith.constant 0 : index
    %c0_17 = arith.constant 0 : index
    %16 = vector.load %arg7[%c0_16, %c0_17] : memref<1x64xf32, #tpu.memory_space<vmem>>, vector<1x64xf32>
    %17 = vector.broadcast %16 : vector<1x64xf32> to vector<32x64xf32>
    %18 = arith.addf %15, %17 : vector<32x64xf32>
    %19 = vector.shape_cast %18 : vector<32x64xf32> to vector<4x8x64xf32>
    %cst_18 = arith.constant dense<0xFF800000> : vector<8x64xf32>
    %20 = vector.multi_reduction <maximumf>, %19, %cst_18 [0] : vector<4x8x64xf32> to vector<8x64xf32>
    %21 = vector.shape_cast %20 : vector<8x64xf32> to vector<1x8x64xf32>
    %22 = vector.broadcast %21 : vector<1x8x64xf32> to vector<4x8x64xf32>
    %23 = arith.subf %19, %22 : vector<4x8x64xf32>
    %24 = math.exp %23 : vector<4x8x64xf32>
    %cst_19 = arith.constant dense<0.000000e+00> : vector<8x64xf32>
    %25 = vector.multi_reduction <add>, %24, %cst_19 [0] : vector<4x8x64xf32> to vector<8x64xf32>
    %26 = vector.shape_cast %25 : vector<8x64xf32> to vector<1x8x64xf32>
    %27 = tpu.reciprocal %26 : vector<1x8x64xf32> -> vector<1x8x64xf32>
    %28 = vector.broadcast %27 : vector<1x8x64xf32> to vector<4x8x64xf32>
    %29 = arith.mulf %24, %28 : vector<4x8x64xf32>
    %30 = vector.extract_strided_slice %29 {offsets = [0, 0, 0], sizes = [4, 8, 32], strides = [1, 1, 1]} : vector<4x8x64xf32> to vector<4x8x32xf32>
    %31 = arith.mulf %30, %0 : vector<4x8x32xf32>
    %cst_20 = arith.constant dense<0.000000e+00> : vector<8x32xf32>
    %32 = vector.multi_reduction <add>, %31, %cst_20 [0] : vector<4x8x32xf32> to vector<8x32xf32>
    %c0_21 = arith.constant 0 : index
    %c0_22 = arith.constant 0 : index
    %33 = vector.load %arg8[%c0_21, %c0_22] : memref<8x32xf32, #tpu.memory_space<vmem>>, vector<8x32xf32>
    tpu.vector_store %arg8[%c0_21, %c0_22], %32 {strides = array<i32>} : memref<8x32xf32, #tpu.memory_space<vmem>>, vector<8x32xf32>,
    %34 = vector.extract_strided_slice %29 {offsets = [0, 0, 32], sizes = [4, 8, 32], strides = [1, 1, 1]} : vector<4x8x64xf32> to vector<4x8x32xf32>
    %35 = arith.mulf %34, %1 : vector<4x8x32xf32>
    %cst_23 = arith.constant dense<0.000000e+00> : vector<8x32xf32>
    %36 = vector.multi_reduction <add>, %35, %cst_23 [0] : vector<4x8x32xf32> to vector<8x32xf32>
    %c0_24 = arith.constant 0 : index
    %c0_25 = arith.constant 0 : index
    %37 = vector.load %arg9[%c0_24, %c0_25] : memref<8x32xf32, #tpu.memory_space<vmem>>, vector<8x32xf32>
    tpu.vector_store %arg9[%c0_24, %c0_25], %36 {strides = array<i32>} : memref<8x32xf32, #tpu.memory_space<vmem>>, vector<8x32xf32>,
    return
  }
  func.func @transform_0(%arg0: i32) -> (i32, i32, i32) {
    %c0_i32 = arith.constant 0 : i32
    %c0_i32_0 = arith.constant 0 : i32
    %c0_i32_1 = arith.constant 0 : i32
    return %c0_i32, %arg0, %c0_i32_0 : i32, i32, i32
  }
  func.func @transform_1(%arg0: i32) -> (i32, i32, i32) {
    %c0_i32 = arith.constant 0 : i32
    %c0_i32_0 = arith.constant 0 : i32
    %c0_i32_1 = arith.constant 0 : i32
    return %c0_i32, %arg0, %c0_i32_0 : i32, i32, i32
  }
  func.func @transform_2(%arg0: i32) -> (i32, i32) {
    %c0_i32 = arith.constant 0 : i32
    %c0_i32_0 = arith.constant 0 : i32
    %c0_i32_1 = arith.constant 0 : i32
    return %c0_i32, %c0_i32_0 : i32, i32
  }
  func.func @transform_3(%arg0: i32) -> (i32, i32) {
    %c0_i32 = arith.constant 0 : i32
    %c0_i32_0 = arith.constant 0 : i32
    %c0_i32_1 = arith.constant 0 : i32
    return %c0_i32, %c0_i32_0 : i32, i32
  }
  func.func @transform_4(%arg0: i32) -> (i32, i32) {
    %c0_i32 = arith.constant 0 : i32
    %c0_i32_0 = arith.constant 0 : i32
    %c0_i32_1 = arith.constant 0 : i32
    return %c0_i32, %c0_i32_0 : i32, i32
  }
  func.func @transform_5(%arg0: i32) -> (i32, i32) {
    %c0_i32 = arith.constant 0 : i32
    %c0_i32_0 = arith.constant 0 : i32
    %c0_i32_1 = arith.constant 0 : i32
    return %c0_i32, %c0_i32_0 : i32, i32
  }
  func.func @transform_6(%arg0: i32) -> (i32, i32) {
    %c0_i32 = arith.constant 0 : i32
    %c0_i32_0 = arith.constant 0 : i32
    %c0_i32_1 = arith.constant 0 : i32
    return %c0_i32, %c0_i32_0 : i32, i32
  }
  func.func @transform_7(%arg0: i32) -> (i32, i32) {
    %c0_i32 = arith.constant 0 : i32
    %c0_i32_0 = arith.constant 0 : i32
    return %arg0, %c0_i32 : i32, i32
  }
  func.func @transform_8(%arg0: i32) -> (i32, i32) {
    %c0_i32 = arith.constant 0 : i32
    %c0_i32_0 = arith.constant 0 : i32
    return %arg0, %c0_i32 : i32, i32
  }
}

module attributes {stable_mosaic.version = 11 : i64} {
  func.func @_gamma_intersection_kernel(%arg0: i32, %arg1: memref<4x8x32xf32, #tpu.memory_space<vmem>>, %arg2: memref<4x8x32xf32, #tpu.memory_space<vmem>>, %arg3: memref<32x64xf32, #tpu.memory_space<vmem>>, %arg4: memref<32x64xf32, #tpu.memory_space<vmem>>, %arg5: memref<1x64xf32, #tpu.memory_space<vmem>>, %arg6: memref<64x64xf32, #tpu.memory_space<vmem>>, %arg7: memref<1x64xf32, #tpu.memory_space<vmem>>, %arg8: memref<8x32xf32, #tpu.memory_space<vmem>>, %arg9: memref<8x32xf32, #tpu.memory_space<vmem>>) attributes {dimension_semantics = [#tpu.dimension_semantics<parallel>], iteration_bounds = array<i64: 1>, scalar_prefetch = 0 : i64, scratch_operands = 0 : i64, tpu.core_type = #tpu.core_type<tc>, window_params = [{transform_indices = @transform_0, window_bounds = array<i64: 4, 8, 32>}, {transform_indices = @transform_1, window_bounds = array<i64: 4, 8, 32>}, {pipeline_mode = #tpu.pipeline_mode<synchronous>, transform_indices = @transform_2, window_bounds = array<i64: 32, 64>}, {pipeline_mode = #tpu.pipeline_mode<synchronous>, transform_indices = @transform_3, window_bounds = array<i64: 32, 64>}, {pipeline_mode = #tpu.pipeline_mode<synchronous>, transform_indices = @transform_4, window_bounds = array<i64: 1, 64>}, {pipeline_mode = #tpu.pipeline_mode<synchronous>, transform_indices = @transform_5, window_bounds = array<i64: 64, 64>}, {pipeline_mode = #tpu.pipeline_mode<synchronous>, transform_indices = @transform_6, window_bounds = array<i64: 1, 64>}, {transform_indices = @transform_7, window_bounds = array<i64: 8, 32>}, {transform_indices = @transform_8, window_bounds = array<i64: 8, 32>}]} {
    %c0 = arith.constant 0 : index
    %c0_0 = arith.constant 0 : index
    %c0_1 = arith.constant 0 : index
    %0 = vector.load %arg1[%c0, %c0_0, %c0_1] : memref<4x8x32xf32, #tpu.memory_space<vmem>>, vector<4x8x32xf32>
    %c0_2 = arith.constant 0 : index
    %c0_3 = arith.constant 0 : index
    %c0_4 = arith.constant 0 : index
    %1 = vector.load %arg2[%c0_2, %c0_3, %c0_4] : memref<4x8x32xf32, #tpu.memory_space<vmem>>, vector<4x8x32xf32>
    %2 = vector.shape_cast %0 : vector<4x8x32xf32> to vector<32x32xf32>
    %3 = vector.shape_cast %1 : vector<4x8x32xf32> to vector<32x32xf32>
    %c0_5 = arith.constant 0 : index
    %c0_6 = arith.constant 0 : index
    %4 = vector.load %arg3[%c0_5, %c0_6] : memref<32x64xf32, #tpu.memory_space<vmem>>, vector<32x64xf32>
    %cst = arith.constant dense<0.000000e+00> : vector<32x64xf32>
    %5 = tpu.matmul %2, %4, %cst {dimension_numbers = #tpu.dot_dimension_numbers<[1], [0], [0], [1], [0, 0, 1, 1], [], []>} : vector<32x32xf32>, vector<32x64xf32>, vector<32x64xf32> -> vector<32x64xf32>
    %c0_7 = arith.constant 0 : index
    %c0_8 = arith.constant 0 : index
    %6 = vector.load %arg4[%c0_7, %c0_8] : memref<32x64xf32, #tpu.memory_space<vmem>>, vector<32x64xf32>
    %cst_9 = arith.constant dense<0.000000e+00> : vector<32x64xf32>
    %7 = tpu.matmul %3, %6, %cst_9 {dimension_numbers = #tpu.dot_dimension_numbers<[1], [0], [0], [1], [0, 0, 1, 1], [], []>} : vector<32x32xf32>, vector<32x64xf32>, vector<32x64xf32> -> vector<32x64xf32>
    %8 = arith.addf %5, %7 : vector<32x64xf32>
    %c0_10 = arith.constant 0 : index
    %c0_11 = arith.constant 0 : index
    %9 = vector.load %arg5[%c0_10, %c0_11] : memref<1x64xf32, #tpu.memory_space<vmem>>, vector<1x64xf32>
    %10 = vector.broadcast %9 : vector<1x64xf32> to vector<32x64xf32>
    %11 = arith.addf %8, %10 : vector<32x64xf32>
    %cst_12 = arith.constant 0.000000e+00 : f32
    %12 = vector.broadcast %cst_12 : f32 to vector<32x64xf32>
    %13 = arith.maximumf %11, %12 : vector<32x64xf32>
    %c0_13 = arith.constant 0 : index
    %c0_14 = arith.constant 0 : index
    %14 = vector.load %arg6[%c0_13, %c0_14] : memref<64x64xf32, #tpu.memory_space<vmem>>, vector<64x64xf32>
    %cst_15 = arith.constant dense<0.000000e+00> : vector<32x64xf32>
    %15 = tpu.matmul %13, %14, %cst_15 {dimension_numbers = #tpu.dot_dimension_numbers<[1], [0], [0], [1], [0, 0, 1, 1], [], []>} : vector<32x64xf32>, vector<64x64xf32>, vector<32x64xf32> -> vector<32x64xf32>
    %c0_16 = arith.constant 0 : index
    %c0_17 = arith.constant 0 : index
    %16 = vector.load %arg7[%c0_16, %c0_17] : memref<1x64xf32, #tpu.memory_space<vmem>>, vector<1x64xf32>
    %17 = vector.broadcast %16 : vector<1x64xf32> to vector<32x64xf32>
    %18 = arith.addf %15, %17 : vector<32x64xf32>
    %19 = vector.shape_cast %18 : vector<32x64xf32> to vector<4x8x64xf32>
    %cst_18 = arith.constant dense<0xFF800000> : vector<8x64xf32>
    %20 = vector.multi_reduction <maximumf>, %19, %cst_18 [0] : vector<4x8x64xf32> to vector<8x64xf32>
    %21 = vector.shape_cast %20 : vector<8x64xf32> to vector<1x8x64xf32>
    %22 = vector.broadcast %21 : vector<1x8x64xf32> to vector<4x8x64xf32>
    %23 = arith.subf %19, %22 : vector<4x8x64xf32>
    %24 = math.exp %23 : vector<4x8x64xf32>
    %cst_19 = arith.constant dense<0.000000e+00> : vector<8x64xf32>
    %25 = vector.multi_reduction <add>, %24, %cst_19 [0] : vector<4x8x64xf32> to vector<8x64xf32>
    %26 = vector.shape_cast %25 : vector<8x64xf32> to vector<1x8x64xf32>
    %27 = tpu.reciprocal %26 : vector<1x8x64xf32> -> vector<1x8x64xf32>
    %28 = vector.broadcast %27 : vector<1x8x64xf32> to vector<4x8x64xf32>
    %29 = arith.mulf %24, %28 : vector<4x8x64xf32>
    %30 = vector.extract_strided_slice %29 {offsets = [0, 0, 0], sizes = [4, 8, 32], strides = [1, 1, 1]} : vector<4x8x64xf32> to vector<4x8x32xf32>
    %31 = arith.mulf %30, %0 : vector<4x8x32xf32>
    %cst_20 = arith.constant dense<0.000000e+00> : vector<8x32xf32>
    %32 = vector.multi_reduction <add>, %31, %cst_20 [0] : vector<4x8x32xf32> to vector<8x32xf32>
    %c0_21 = arith.constant 0 : index
    %c0_22 = arith.constant 0 : index
    %33 = vector.load %arg8[%c0_21, %c0_22] : memref<8x32xf32, #tpu.memory_space<vmem>>, vector<8x32xf32>
    tpu.vector_store %arg8[%c0_21, %c0_22], %32 {strides = array<i32>} : memref<8x32xf32, #tpu.memory_space<vmem>>, vector<8x32xf32>,
    %34 = vector.extract_strided_slice %29 {offsets = [0, 0, 32], sizes = [4, 8, 32], strides = [1, 1, 1]} : vector<4x8x64xf32> to vector<4x8x32xf32>
    %35 = arith.mulf %34, %1 : vector<4x8x32xf32>
    %cst_23 = arith.constant dense<0.000000e+00> : vector<8x32xf32>
    %36 = vector.multi_reduction <add>, %35, %cst_23 [0] : vector<4x8x32xf32> to vector<8x32xf32>
    %c0_24 = arith.constant 0 : index
    %c0_25 = arith.constant 0 : index
    %37 = vector.load %arg9[%c0_24, %c0_25] : memref<8x32xf32, #tpu.memory_space<vmem>>, vector<8x32xf32>
    tpu.vector_store %arg9[%c0_24, %c0_25], %36 {strides = array<i32>} : memref<8x32xf32, #tpu.memory_space<vmem>>, vector<8x32xf32>,
    return
  }
  func.func @transform_0(%arg0: i32) -> (i32, i32, i32) {
    %c0_i32 = arith.constant 0 : i32
    %c0_i32_0 = arith.constant 0 : i32
    %c0_i32_1 = arith.constant 0 : i32
    return %c0_i32, %arg0, %c0_i32_0 : i32, i32, i32
  }
  func.func @transform_1(%arg0: i32) -> (i32, i32, i32) {
    %c0_i32 = arith.constant 0 : i32
    %c0_i32_0 = arith.constant 0 : i32
    %c0_i32_1 = arith.constant 0 : i32
    return %c0_i32, %arg0, %c0_i32_0 : i32, i32, i32
  }
  func.func @transform_2(%arg0: i32) -> (i32, i32) {
    %c0_i32 = arith.constant 0 : i32
    %c0_i32_0 = arith.constant 0 : i32
    %c0_i32_1 = arith.constant 0 : i32
    return %c0_i32, %c0_i32_0 : i32, i32
  }
  func.func @transform_3(%arg0: i32) -> (i32, i32) {
    %c0_i32 = arith.constant 0 : i32
    %c0_i32_0 = arith.constant 0 : i32
    %c0_i32_1 = arith.constant 0 : i32
    return %c0_i32, %c0_i32_0 : i32, i32
  }
  func.func @transform_4(%arg0: i32) -> (i32, i32) {
    %c0_i32 = arith.constant 0 : i32
    %c0_i32_0 = arith.constant 0 : i32
    %c0_i32_1 = arith.constant 0 : i32
    return %c0_i32, %c0_i32_0 : i32, i32
  }
  func.func @transform_5(%arg0: i32) -> (i32, i32) {
    %c0_i32 = arith.constant 0 : i32
    %c0_i32_0 = arith.constant 0 : i32
    %c0_i32_1 = arith.constant 0 : i32
    return %c0_i32, %c0_i32_0 : i32, i32
  }
  func.func @transform_6(%arg0: i32) -> (i32, i32) {
    %c0_i32 = arith.constant 0 : i32
    %c0_i32_0 = arith.constant 0 : i32
    %c0_i32_1 = arith.constant 0 : i32
    return %c0_i32, %c0_i32_0 : i32, i32
  }
  func.func @transform_7(%arg0: i32) -> (i32, i32) {
    %c0_i32 = arith.constant 0 : i32
    %c0_i32_0 = arith.constant 0 : i32
    return %arg0, %c0_i32 : i32, i32
  }
  func.func @transform_8(%arg0: i32) -> (i32, i32) {
    %c0_i32 = arith.constant 0 : i32
    %c0_i32_0 = arith.constant 0 : i32
    return %arg0, %c0_i32 : i32, i32
  }
}

</mosaic_0001>

<bundles_post_ra>
// kernel: tpu_custom_call.1
= control target key start
LH: loop header
LB: loop body
LE: loop exit
PB: predicated region body
PF: predicated region fallthrough
CT: control target
= control target key end

     0   :  { %14 = vsyncpa [#allocation3], 0  ;;  %s1074_s0 = inlined_call_operand.hbm [shape: f32[4,8,32], index: 0, kind: input, shape index: {}]   ;;  %s1075_s1 = inlined_call_operand.hbm [shape: f32[4,8,32], index: 1, kind: input, shape index: {}]   ;;  %s1076_s2 = inlined_call_operand.hbm [shape: f32[32,64], index: 2, kind: input, shape index: {}]   ;;  %s1077_s3 = inlined_call_operand.hbm [shape: f32[32,64], index: 3, kind: input, shape index: {}]   ;;  %s1078_s4 = inlined_call_operand.vmem [shape: f32[1,64], index: 4, kind: input, shape index: {}]   ;;  %s1079_s5 = inlined_call_operand.hbm [shape: f32[64,64], index: 5, kind: input, shape index: {}]   ;;  %s1080_s6 = inlined_call_operand.vmem [shape: f32[1,64], index: 6, kind: input, shape index: {}]   ;;  %s1081_s7 = inlined_call_operand.hbm [shape: f32[8,32], index: 7, kind: output, shape index: {0}]   ;;  %s1082_s8 = inlined_call_operand.hbm [shape: f32[8,32], index: 8, kind: output, shape index: {1}]  }
   0x1   :  { %15 = vsyncpa [#allocation6], 0 }
   0x2   :  { %16 = vsyncpa [#allocation9], 0 }
   0x3   :  { %17 = vsyncpa [#allocation4], 0 }
   0x4   :  { %18 = vsyncpa [#allocation13], 0  ;;  %s853_s27 = smov [#allocation5]   ;;  %s854_s29 = smov [#allocation8]  }
   0x5   :  { %s36_s28 = sshll.u32 %s853_s27, 4  ;;  %s60_s30 = sshll.u32 %s854_s29, 4  ;;  %s37_s28 = int_to_ptr.vmem [resolvable:$true] %s36_s28  ;;  %s909_s30 = int_to_ptr.vmem [resolvable:$true] %s60_s30 }
   0x6   :  { %s689_s11 = scalar_lea.hbm %s1075_s1, 512 }
   0x7   :  { %p690_p0 = scmp.ne.s32.totalorder %s1075_s1, %s689_s11  ;;  %p693_p1 = scmp.lt.u32.totalorder %s689_s11, %s1075_s1 }
   0x9   :  { %p695_p2 = pnand %p693_p1, %p690_p0 }
   0xb   :  { %698 = shalt.err (!%p695_p2)
}
   0xc   :  { %s699_s16 = scalar_lea.vmem %s37_s28, 512  ;;  %p704_p4 = scmp.lt.s32.totalorder %s37_s28, %s37_s28 }
   0xd   :  { %p700_p3 = scmp.ne.s32.totalorder %s37_s28, %s699_s16  ;;  %p705_p5 = scmp.lt.s32.totalorder %s699_s16, %s699_s16 }
   0xf   :  { %p706_p6 = por %p705_p5, %p704_p4 }
  0x11   :  { %p707_p7 = pnand %p706_p6, %p700_p3 }
  0x13   :  { %710 = shalt.err (!%p707_p7)
}
  0x14   :  { %s855_s17 = smov 128   ;;  %s856_s18 = smov 8  }
  0x15   :  { %42 = dma.hbm_to_vmem [thread:$0]  %s1075_s1, 512, %s37_s28, [#allocation6], %s855_s17, %s855_s17, %s856_s18  }
  0x16   :  { %s711_s23 = scalar_lea.hbm %s1077_s3, 512 }
  0x17   :  { %p712_p8 = scmp.ne.s32.totalorder %s1077_s3, %s711_s23  ;;  %p715_p9 = scmp.lt.u32.totalorder %s711_s23, %s1077_s3 }
  0x19   :  { %p717_p10 = pnand %p715_p9, %p712_p8 }
  0x1b   :  { %720 = shalt.err (!%p717_p10)
}
  0x1c   :  { %s721_s29 = scalar_lea.vmem %s909_s30, 512  ;;  %p726_p12 = scmp.lt.s32.totalorder %s909_s30, %s909_s30 }
  0x1d   :  { %p722_p11 = scmp.ne.s32.totalorder %s909_s30, %s721_s29  ;;  %p727_p13 = scmp.lt.s32.totalorder %s721_s29, %s721_s29 }
  0x1f   :  { %p728_p0 = por %p727_p13, %p726_p12 }
  0x21   :  { %p729_p1 = pnand %p728_p0, %p722_p11 }
  0x23   :  { %732 = shalt.err (!%p729_p1)
}
  0x24   :  { %66 = dma.hbm_to_vmem [thread:$0]  %s1077_s3, 512, %s909_s30, [#allocation9], %s855_s17, %s855_s17, %s856_s18  }
  0x25   :  { %s857_s9 = smov [#allocation2]   ;;  %s858_s11 = smov [#allocation7]  }
  0x26   :  { %s24_s10 = sshll.u32 %s857_s9, 4  ;;  %s48_s12 = sshll.u32 %s858_s11, 4  ;;  %s25_s10 = int_to_ptr.vmem [resolvable:$true] %s24_s10  ;;  %s946_s12 = int_to_ptr.vmem [resolvable:$true] %s48_s12 }
  0x27   :  { %s733_s15 = scalar_lea.hbm %s1074_s0, 512 }
  0x28   :  { %p734_p2 = scmp.ne.s32.totalorder %s1074_s0, %s733_s15  ;;  %p737_p3 = scmp.lt.u32.totalorder %s733_s15, %s1074_s0 }
  0x2a   :  { %p739_p4 = pnand %p737_p3, %p734_p2 }
  0x2c   :  { %742 = shalt.err (!%p739_p4)
}
  0x2d   :  { %s743_s3 = scalar_lea.vmem %s25_s10, 512  ;;  %p748_p6 = scmp.lt.s32.totalorder %s25_s10, %s25_s10 }
  0x2e   :  { %p744_p5 = scmp.ne.s32.totalorder %s25_s10, %s743_s3  ;;  %p749_p7 = scmp.lt.s32.totalorder %s743_s3, %s743_s3 }
  0x30   :  { %p750_p8 = por %p749_p7, %p748_p6 }
  0x32   :  { %p751_p9 = pnand %p750_p8, %p744_p5 }
  0x34   :  { %754 = shalt.err (!%p751_p9)
}
  0x35   :  { %30 = dma.hbm_to_vmem [thread:$0]  %s1074_s0, 512, %s25_s10, [#allocation3], %s855_s17, %s855_s17, %s856_s18  }
  0x36   :  { %s755_s25 = scalar_lea.hbm %s1076_s2, 512 }
  0x37   :  { %p756_p10 = scmp.ne.s32.totalorder %s1076_s2, %s755_s25  ;;  %p759_p11 = scmp.lt.u32.totalorder %s755_s25, %s1076_s2 }
  0x39   :  { %p761_p12 = pnand %p759_p11, %p756_p10 }
  0x3b   :  { %764 = shalt.err (!%p761_p12)
}
  0x3c   :  { %s765_s28 = scalar_lea.vmem %s946_s12, 512  ;;  %p770_p0 = scmp.lt.s32.totalorder %s946_s12, %s946_s12 }
  0x3d   :  { %p766_p13 = scmp.ne.s32.totalorder %s946_s12, %s765_s28  ;;  %p771_p1 = scmp.lt.s32.totalorder %s765_s28, %s765_s28 }
  0x3f   :  { %p772_p2 = por %p771_p1, %p770_p0 }
  0x41   :  { %p773_p3 = pnand %p772_p2, %p766_p13 }
  0x43   :  { %776 = shalt.err (!%p773_p3)
}
  0x44   :  { %54 = dma.hbm_to_vmem [thread:$0]  %s1076_s2, 512, %s946_s12, [#allocation6], %s855_s17, %s855_s17, %s856_s18  }
  0x45   :  { %s859_s10 = smov [#allocation10]   ;;  %s777_s15 = scalar_lea.hbm %s1079_s5, 1024 }
  0x46   :  { %s74_s11 = sshll.u32 %s859_s10, 4  ;;  %p778_p4 = scmp.ne.s32.totalorder %s1079_s5, %s777_s15  ;;  %s75_s11 = int_to_ptr.vmem [resolvable:$true] %s74_s11 }
  0x47   :  { %p781_p5 = scmp.lt.u32.totalorder %s777_s15, %s1079_s5 }
  0x49   :  { %p783_p6 = pnand %p781_p5, %p778_p4 }
  0x4b   :  { %786 = shalt.err (!%p783_p6)
}
  0x4c   :  { %s787_s3 = scalar_lea.vmem %s75_s11, 1024  ;;  %p792_p8 = scmp.lt.s32.totalorder %s75_s11, %s75_s11 }
  0x4d   :  { %p788_p7 = scmp.ne.s32.totalorder %s75_s11, %s787_s3  ;;  %p793_p9 = scmp.lt.s32.totalorder %s787_s3, %s787_s3 }
  0x4f   :  { %p794_p10 = por %p793_p9, %p792_p8 }
  0x51   :  { %p795_p11 = pnand %p794_p10, %p788_p7 }
  0x53   :  { %798 = shalt.err (!%p795_p11)
}
  0x54   :  { %80 = dma.hbm_to_vmem [thread:$0]  %s1079_s5, 1024, %s75_s11, [#allocation9], %s855_s17, %s855_s17, %s856_s18  }
  0x55   :  { %843 = dma.done.wait [#allocation3], 512  }
  0x56   :  { %844 = vsyncadd [#allocation3], 4294966784 }
  0x57   :  { %845 = dma.done.wait [#allocation6], 1024  }
  0x58   :  { %846 = vsyncadd [#allocation6], 4294966272 }
  0x59   :  { %847 = dma.done.wait [#allocation9], 1536  }
  0x5a   :  { %848 = vsyncadd [#allocation9], 4294965760  ;;  %vm114_vm0 = vcmask 261120   ;;  %v110_v0 = vld [vmem:[#allocation8] sm:$0xff]  ;;  %v111_v1 = vld [vmem:[#allocation8 + $0x8] sm:$0xff]  ;;  %s860_s5 = smov 32  }
  0x5b   :  { %v112_v2 = vld [vmem:[#allocation8 + $0x10] sm:$0xff]  ;;  %v632_v3 = vpack.c.bf16 %v111_v1, %v110_v0  ;;  %v113_v4 = vld [vmem:[#allocation8 + $0x18] sm:$0xff]  ;;  %v102_v5 = vld [vmem:[#allocation5] sm:$0xff]  ;;  %vm339_vm1 = vcmask 523264   ;;  %vm496_vm2 = vcmask 523520   ;;  %s862_s23 = smov 96  }
  0x5c   :  { %v636_v6 = vpack.c.bf16 %v113_v4, %v112_v2  ;;  %590 = vmatprep.mubr.msk.f32.mxu0 %vm114_vm0, %v102_v5  ;;  %v106_v7 = vld [vmem:[#allocation7] sm:$0xff]  ;;  %v107_v8 = vld [vmem:[#allocation7 + $0x8] sm:$0xff]  ;;  %v108_v10 = vld [vmem:[#allocation7 + $0x10] sm:$0xff]  ;;  %480 = vrot.lane.b32.xlu0 %v102_v5, %s860_s5 }
  0x5d   :  { %633 = vmatprep.subr.bf16.mxu0 %v632_v3  ;;  %v640_v9 = vpack.c.bf16 %v107_v8, %v106_v7  ;;  %v324_v11 = vld [vmem:[#allocation10] sm:$0xff]  ;;  %v325_v12 = vld [vmem:[#allocation10 + $0x8] sm:$0xff]  ;;  %v109_v13 = vld [vmem:[#allocation7 + $0x18] sm:$0xff] }
  0x5e   :  { %635 = vmatpush3.bf16.msra.mxu0 %v632_v3  ;;  %v648_v14 = vpack.c.bf16 %v325_v12, %v324_v11  ;;  %v326_v15 = vld [vmem:[#allocation10 + $0x10] sm:$0xff]  ;;  %v327_v16 = vld [vmem:[#allocation10 + $0x18] sm:$0xff]  ;;  %v328_v18 = vld [vmem:[#allocation10 + $0x20] sm:$0xff]  ;;  %v644_v22 = vpack.c.bf16 %v109_v13, %v108_v10 }
  0x5f   :  { %637 = vmatprep.subr.bf16.mxu0 %v636_v6  ;;  %v652_v17 = vpack.c.bf16 %v327_v16, %v326_v15  ;;  %v329_v19 = vld [vmem:[#allocation10 + $0x28] sm:$0xff]  ;;  %v104_v21 = vld [vmem:[#allocation5 + $0x10] sm:$0xff]  ;;  %v105_v24 = vld [vmem:[#allocation5 + $0x18] sm:$0xff] }
  0x60   :  { %v103_v20 = vld [vmem:[#allocation5 + $0x8] sm:$0xff]  ;;  %649 = vmatprep.subr.bf16.mxu1 %v648_v14  ;;  %v656_v23 = vpack.c.bf16 %v329_v19, %v328_v18  ;;  %v1001_v25 = vld [vmem:[#allocation2] sm:$0xff]  ;;  %v1008_v27 = vld [vmem:[#allocation2 + $0x10] sm:$0xff]  ;;  %484 = vrot.lane.b32.xlu1 %v104_v21, %s860_s5 }
  0x61   :  { %651 = vmatpush3.bf16.msra.mxu1 %v648_v14  ;;  %v1006_v26 = vld [vmem:[#allocation2 + $0x8] sm:$0xff]  ;;  %v1014_v28 = vld [vmem:[#allocation2 + $0x18] sm:$0xff]  ;;  %v330_v29 = vld [vmem:[#allocation10 + $0x30] sm:$0xff]  ;;  %482 = vrot.lane.b32.xlu0 %v103_v20, %s860_s5 }
  0x62   :  { %639 = vmatpush3.bf16.msra.mxu0 %v636_v6  ;;  %653 = vmatprep.subr.bf16.mxu1 %v652_v17  ;;  %v331_v30 = vld [vmem:[#allocation10 + $0x38] sm:$0xff]  ;;  %v548_v32 = vld [vmem:[%s1078_s4] ss:$0 sm:$0xff] }
  0x63   :  { %641 = vmatprep.subr.bf16.mxu0 %v640_v9  ;;  %v660_v31 = vpack.c.bf16 %v331_v30, %v330_v29  ;;  %v549_v45 = vld [vmem:[%s1080_s6] ss:$0 sm:$0xff]  ;;  %s861_s6 = smov [#allocation11]  }
  0x64   :  { %486 = vrot.lane.b32.xlu1 %v105_v24, %s860_s5  ;;  %s515_s22 = sshll.u32 %s861_s6, 4  ;;  %s516_s22 = int_to_ptr.vmem [resolvable:$true] %s515_s22 }
  0x65   :  { %591 = vmatmul.mubr.msk.f32.vlgmr.msra.gmra.mrb[0].mxu0 %vm114_vm0, %v103_v20  ;;  %655 = vmatpush3.bf16.msra.mxu1 %v652_v17  ;;  %s799_s24 = scalar_lea.vmem %s516_s22, 128  ;;  %p804_p13 = scmp.lt.s32.totalorder %s516_s22, %s516_s22 }
  0x66   :  { %643 = vmatpush3.bf16.msra.mxu0 %v640_v9  ;;  %593 = vmatprep.mubr.msk.f32.mxu0 %vm114_vm0, %v104_v21  ;;  %p800_p12 = scmp.ne.s32.totalorder %s516_s22, %s799_s24  ;;  %p805_p0 = scmp.lt.s32.totalorder %s799_s24, %s799_s24 }
  0x67   :  { %645 = vmatprep.subr.bf16.mxu0 %v644_v22  ;;  %657 = vmatprep.subr.bf16.mxu1 %v656_v23 }
  0x68   :  { %p806_p1 = por %p805_p0, %p804_p13 }
  0x69   :  { %594 = vmatmul.mubr.msk.f32.gmra.mrb[2].mxu0 %vm114_vm0, %v105_v24  ;;  %659 = vmatpush3.bf16.msra.mxu1 %v656_v23 }
  0x6a   :  { %647 = vmatpush3.bf16.msra.mxu0 %v644_v22  ;;  %604 = vmatprep.mubr.msk.f32.mxu0 %vm114_vm0, %v1001_v25  ;;  %p807_p2 = pnand %p806_p1, %p800_p12 }
  0x6b   :  { %661 = vmatprep.subr.bf16.mxu1 %v660_v31 }
  0x6d   :  { %605 = vmatmul.mubr.msk.f32.vlgmr.msra.gmra.mrb[0].mxu0 %vm114_vm0, %v1006_v26  ;;  %663 = vmatpush3.bf16.msra.mxu1 %v660_v31 }
  0x6e   :  { %607 = vmatprep.mubr.msk.f32.mxu0 %vm114_vm0, %v1008_v27 }
  0x71   :  { %608 = vmatmul.mubr.msk.f32.gmra.mrb[2].mxu0 %vm114_vm0, %v1014_v28 }
  0xce   :  { %v481_v16 = vpop.permute.xlu0 %480 }
  0xd2   :  { %v485_v17 = vpop.permute.xlu1 %484 }
  0xd3   :  { %v483_v22 = vpop.permute.xlu0 %482 }
  0xd6   :  { %v487_v30 = vpop.permute.xlu1 %486 }
 0x140   :  { %v606_v33 = vpop.f32.mrb[0].mxu0 }
 0x141   :  { %v317_v34 = vadd.f32 %v606_v33, %v548_v32  ;;  %v290_v35 = vpop.f32.mrb[1].mxu0 }
 0x142   :  { %v316_v36 = vadd.f32 %v548_v32, %v290_v35 }
 0x143   :  { %v321_v39 = vmax.f32 %v317_v34, 0.0 }
 0x144   :  { %v320_v37 = vmax.f32 %v316_v36, 0.0  ;;  %v609_v38 = vpop.f32.mrb[2].mxu0 }
 0x145   :  { %v319_v40 = vadd.f32 %v609_v38, %v548_v32  ;;  %v300_v41 = vpop.f32.mrb[3].mxu0 }
 0x146   :  { %v318_v42 = vadd.f32 %v548_v32, %v300_v41  ;;  %626 = vmatprep.mubr.msk.f32.mxu1 %vm339_vm1, %v320_v37 }
 0x147   :  { %627 = vmatmul.mubr.msk.f32.vlgmr.msra.gmra.mrb[0].mxu1 %vm339_vm1, %v321_v39  ;;  %v323_v44 = vmax.f32 %v319_v40, 0.0 }
 0x148   :  { %v322_v43 = vmax.f32 %v318_v42, 0.0 }
 0x14a   :  { %629 = vmatprep.mubr.msk.f32.mxu1 %vm339_vm1, %v322_v43 }
 0x14b   :  { %630 = vmatmul.mubr.msk.f32.gmra.mrb[2].mxu1 %vm339_vm1, %v323_v44 }
 0x21a   :  { %v628_v46 = vpop.f32.mrb[0].mxu1 }
 0x21b   :  { %v424_v47 = vadd.f32 %v628_v46, %v549_v45  ;;  %v418_v48 = vpop.f32.mrb[1].mxu1 }
 0x21c   :  { %v419_v49 = vadd.f32 %v549_v45, %v418_v48 }
 0x21d   :  { %v438_v50 = vsel %vm339_vm1, %v424_v47, -inf }
 0x21e   :  { %v437_v51 = vsel %vm339_vm1, %v419_v49, -inf  ;;  %v631_v52 = vpop.f32.mrb[2].mxu1 }
 0x21f   :  { %v441_v53 = vmax.f32 %v437_v51, %v438_v50  ;;  %v434_v54 = vadd.f32 %v631_v52, %v549_v45  ;;  %v428_v55 = vpop.f32.mrb[3].mxu1 }
 0x220   :  { %v429_v56 = vadd.f32 %v549_v45, %v428_v55 }
 0x221   :  { %v440_v57 = vsel %vm339_vm1, %v434_v54, -inf }
 0x222   :  { %v439_v58 = vsel %vm339_vm1, %v429_v56, -inf }
 0x223   :  { %v442_v59 = vmax.f32 %v439_v58, %v440_v57 }
 0x225   :  { %v443_v60 = vmax.f32 %v441_v53, %v442_v59 }
 0x227   :  { %v444_v61 = vsub.f32 %v419_v49, %v443_v60  ;;  %v445_v62 = vsub.f32 %v424_v47, %v443_v60  ;;  %v446_v63 = vsub.f32 %v429_v56, %v443_v60  ;;  %v447_v0 = vsub.f32 %v434_v54, %v443_v60 }
 0x229   :  { %v448_v1 = vmul.f32 1.442695, %v444_v61  ;;  %v450_v2 = vmul.f32 1.442695, %v445_v62  ;;  %v452_v3 = vmul.f32 1.442695, %v446_v63 }
 0x22a   :  { %v454_v4 = vmul.f32 1.442695, %v447_v0 }
 0x22b   :  { %679 = vpow2.f32 %v448_v1 }
 0x22c   :  { %681 = vpow2.f32 %v450_v2 }
 0x22d   :  { %683 = vpow2.f32 %v452_v3 }
 0x22e   :  { %685 = vpow2.f32 %v454_v4 }
 0x235   :  { %v680_v5 = vpop.eup %679 }
 0x236   :  { %v682_v6 = vpop.eup %681  ;;  %v456_v7 = vsel %vm339_vm1, %v680_v5, 0.0 }
 0x237   :  { %v684_v8 = vpop.eup %683  ;;  %v457_v9 = vsel %vm339_vm1, %v682_v6, 0.0 }
 0x238   :  { %v686_v10 = vpop.eup %685  ;;  %v458_v11 = vadd.f32 %v457_v9, %v456_v7  ;;  %v459_v12 = vsel %vm339_vm1, %v684_v8, 0.0 }
 0x239   :  { %v461_v14 = vsel %vm339_vm1, %v686_v10, 0.0 }
 0x23a   :  { %v460_v13 = vadd.f32 %v459_v12, %v458_v11 }
 0x23c   :  { %v462_v15 = vadd.f32 %v461_v14, %v460_v13 }
 0x23e   :  { %687 = vrcp.f32 %v462_v15 }
 0x248   :  { %v688_v18 = vpop.eup %687 }
 0x249   :  { %v466_v19 = vmul.f32 %v688_v18, %v684_v8  ;;  %v464_v20 = vmul.f32 %v688_v18, %v680_v5  ;;  %v467_v21 = vmul.f32 %v688_v18, %v686_v10  ;;  %v465_v23 = vmul.f32 %v688_v18, %v682_v6 }
 0x24b   :  { %v468_v24 = vmul.f32 %v464_v20, %v1001_v25  ;;  %v492_v29 = vmul.f32 %v481_v16, %v464_v20  ;;  %v470_v31 = vmul.f32 %v466_v19, %v1008_v27  ;;  %v494_v32 = vmul.f32 %v485_v17, %v466_v19 }
 0x24c   :  { %v469_v33 = vmul.f32 %v465_v23, %v1006_v26  ;;  %v493_v34 = vmul.f32 %v483_v22, %v465_v23  ;;  %v471_v37 = vmul.f32 %v467_v21, %v1014_v28  ;;  %v495_v38 = vmul.f32 %v487_v30, %v467_v21 }
 0x24d   :  { %v472_v35 = vsel %vm114_vm0, %v468_v24, 0.0  ;;  %v497_v36 = vsel %vm496_vm2, %v492_v29, 0.0  ;;  %v475_v42 = vsel %vm114_vm0, %v470_v31, 0.0  ;;  %v500_v27 = vsel %vm496_vm2, %v494_v32, 0.0 }
 0x24e   :  { %v473_v39 = vsel %vm114_vm0, %v469_v33, 0.0  ;;  %v498_v40 = vsel %vm496_vm2, %v493_v34, 0.0  ;;  %v477_v44 = vsel %vm114_vm0, %v471_v37, 0.0  ;;  %v502_v45 = vsel %vm496_vm2, %v495_v38, 0.0 }
 0x24f   :  { %v474_v25 = vadd.f32 %v473_v39, %v472_v35  ;;  %v499_v41 = vadd.f32 %v498_v40, %v497_v36 }
 0x251   :  { %v501_v26 = vadd.f32 %v500_v27, %v499_v41  ;;  %v476_v43 = vadd.f32 %v475_v42, %v474_v25 }
 0x253   :  { %v503_v28 = vadd.f32 %v502_v45, %v501_v26  ;;  %v478_v46 = vadd.f32 %v477_v44, %v476_v43 }
 0x255   :  { %505 = vrot.lane.b32.xlu0 %v503_v28, %s862_s23  ;;  %479 = vst.msk [vmem:[#allocation11] sm:$0xff] %vm114_vm0, %v478_v46 }
 0x256   :  { %810 = shalt.err (!%p807_p2)
}
 0x257   :  { %s811_s27 = scalar_lea.hbm %s1081_s7, 128 }
 0x258   :  { %p812_p3 = scmp.ne.s32.totalorder %s1081_s7, %s811_s27  ;;  %p815_p4 = scmp.lt.u32.totalorder %s811_s27, %s1081_s7 }
 0x25a   :  { %p817_p5 = pnand %p815_p4, %p812_p3 }
 0x25c   :  { %820 = shalt.err (!%p817_p5)
}
 0x25d   :  { %518 = dma.vmem_to_hbm [thread:$0]  %s516_s22, 128, %s1081_s7, [#allocation4]  }
 0x25e   :  { %s863_s11 = smov [#allocation12]  }
 0x25f   :  { %s525_s13 = sshll.u32 %s863_s11, 4  ;;  %s526_s13 = int_to_ptr.vmem [resolvable:$true] %s525_s13 }
 0x260   :  { %s821_s14 = scalar_lea.vmem %s526_s13, 128  ;;  %p826_p7 = scmp.lt.s32.totalorder %s526_s13, %s526_s13 }
 0x261   :  { %p822_p6 = scmp.ne.s32.totalorder %s526_s13, %s821_s14  ;;  %p827_p8 = scmp.lt.s32.totalorder %s821_s14, %s821_s14 }
 0x263   :  { %p828_p9 = por %p827_p8, %p826_p7 }
 0x265   :  { %p829_p10 = pnand %p828_p9, %p822_p6 }
 0x2c7   :  { %v506_v47 = vpop.permute.xlu0 %505 }
 0x2c8   :  { %508 = vst.msk [vmem:[#allocation12] sm:$0xff] %vm114_vm0, %v506_v47 }
 0x2c9   :  { %832 = shalt.err (!%p829_p10)
}
 0x2ca   :  { %s833_s19 = scalar_lea.hbm %s1082_s8, 128 }
 0x2cb   :  { %p834_p11 = scmp.ne.s32.totalorder %s1082_s8, %s833_s19  ;;  %p837_p12 = scmp.lt.u32.totalorder %s833_s19, %s1082_s8 }
 0x2cd   :  { %p839_p13 = pnand %p837_p12, %p834_p11 }
 0x2cf   :  { %842 = shalt.err (!%p839_p13)
}
 0x2d0   :  { %528 = dma.vmem_to_hbm [thread:$0]  %s526_s13, 128, %s1082_s8, [#allocation13]  }
 0x2d1   :  { %849 = dma.done.wait [#allocation4], 128  }
 0x2d2   :  { %850 = vsyncadd [#allocation4], 4294967168 }
 0x2d3   :  { %851 = dma.done.wait [#allocation13], 128  }
 0x2d4   :  { %852 = vsyncadd [#allocation13], 4294967168 }
 0x2d5   :  { %535 = vsyncpa [#allocation3], 1 }
 0x2d6   :  { %536 = vsyncpa [#allocation6], 1 }
 0x2d7   :  { %537 = vsyncpa [#allocation9], 1 }
 0x2d8   :  { %538 = vsyncpa [#allocation4], 1 }
 0x2d9   :  { %539 = vsyncpa [#allocation13], 1 }

// kernel: tpu_custom_call.1
= control target key start
LH: loop header
LB: loop body
LE: loop exit
PB: predicated region body
PF: predicated region fallthrough
CT: control target
= control target key end

     0   :  { %14 = vsyncpa [#allocation3], 0  ;;  %s1074_s0 = inlined_call_operand.hbm [shape: f32[4,8,32], index: 0, kind: input, shape index: {}]   ;;  %s1075_s1 = inlined_call_operand.hbm [shape: f32[4,8,32], index: 1, kind: input, shape index: {}]   ;;  %s1076_s2 = inlined_call_operand.hbm [shape: f32[32,64], index: 2, kind: input, shape index: {}]   ;;  %s1077_s3 = inlined_call_operand.hbm [shape: f32[32,64], index: 3, kind: input, shape index: {}]   ;;  %s1078_s4 = inlined_call_operand.vmem [shape: f32[1,64], index: 4, kind: input, shape index: {}]   ;;  %s1079_s5 = inlined_call_operand.hbm [shape: f32[64,64], index: 5, kind: input, shape index: {}]   ;;  %s1080_s6 = inlined_call_operand.vmem [shape: f32[1,64], index: 6, kind: input, shape index: {}]   ;;  %s1081_s7 = inlined_call_operand.hbm [shape: f32[8,32], index: 7, kind: output, shape index: {0}]   ;;  %s1082_s8 = inlined_call_operand.hbm [shape: f32[8,32], index: 8, kind: output, shape index: {1}]  }
   0x1   :  { %15 = vsyncpa [#allocation6], 0 }
   0x2   :  { %16 = vsyncpa [#allocation9], 0 }
   0x3   :  { %17 = vsyncpa [#allocation4], 0 }
   0x4   :  { %18 = vsyncpa [#allocation13], 0  ;;  %s853_s27 = smov [#allocation5]   ;;  %s854_s29 = smov [#allocation8]  }
   0x5   :  { %s36_s28 = sshll.u32 %s853_s27, 4  ;;  %s60_s30 = sshll.u32 %s854_s29, 4  ;;  %s37_s28 = int_to_ptr.vmem [resolvable:$true] %s36_s28  ;;  %s909_s30 = int_to_ptr.vmem [resolvable:$true] %s60_s30 }
   0x6   :  { %s689_s11 = scalar_lea.hbm %s1075_s1, 512 }
   0x7   :  { %p690_p0 = scmp.ne.s32.totalorder %s1075_s1, %s689_s11  ;;  %p693_p1 = scmp.lt.u32.totalorder %s689_s11, %s1075_s1 }
   0x9   :  { %p695_p2 = pnand %p693_p1, %p690_p0 }
   0xb   :  { %698 = shalt.err (!%p695_p2)
}
   0xc   :  { %s699_s16 = scalar_lea.vmem %s37_s28, 512  ;;  %p704_p4 = scmp.lt.s32.totalorder %s37_s28, %s37_s28 }
   0xd   :  { %p700_p3 = scmp.ne.s32.totalorder %s37_s28, %s699_s16  ;;  %p705_p5 = scmp.lt.s32.totalorder %s699_s16, %s699_s16 }
   0xf   :  { %p706_p6 = por %p705_p5, %p704_p4 }
  0x11   :  { %p707_p7 = pnand %p706_p6, %p700_p3 }
  0x13   :  { %710 = shalt.err (!%p707_p7)
}
  0x14   :  { %s855_s17 = smov 128   ;;  %s856_s18 = smov 8  }
  0x15   :  { %42 = dma.hbm_to_vmem [thread:$0]  %s1075_s1, 512, %s37_s28, [#allocation6], %s855_s17, %s855_s17, %s856_s18  }
  0x16   :  { %s711_s23 = scalar_lea.hbm %s1077_s3, 512 }
  0x17   :  { %p712_p8 = scmp.ne.s32.totalorder %s1077_s3, %s711_s23  ;;  %p715_p9 = scmp.lt.u32.totalorder %s711_s23, %s1077_s3 }
  0x19   :  { %p717_p10 = pnand %p715_p9, %p712_p8 }
  0x1b   :  { %720 = shalt.err (!%p717_p10)
}
  0x1c   :  { %s721_s29 = scalar_lea.vmem %s909_s30, 512  ;;  %p726_p12 = scmp.lt.s32.totalorder %s909_s30, %s909_s30 }
  0x1d   :  { %p722_p11 = scmp.ne.s32.totalorder %s909_s30, %s721_s29  ;;  %p727_p13 = scmp.lt.s32.totalorder %s721_s29, %s721_s29 }
  0x1f   :  { %p728_p0 = por %p727_p13, %p726_p12 }
  0x21   :  { %p729_p1 = pnand %p728_p0, %p722_p11 }
  0x23   :  { %732 = shalt.err (!%p729_p1)
}
  0x24   :  { %66 = dma.hbm_to_vmem [thread:$0]  %s1077_s3, 512, %s909_s30, [#allocation9], %s855_s17, %s855_s17, %s856_s18  }
  0x25   :  { %s857_s9 = smov [#allocation2]   ;;  %s858_s11 = smov [#allocation7]  }
  0x26   :  { %s24_s10 = sshll.u32 %s857_s9, 4  ;;  %s48_s12 = sshll.u32 %s858_s11, 4  ;;  %s25_s10 = int_to_ptr.vmem [resolvable:$true] %s24_s10  ;;  %s946_s12 = int_to_ptr.vmem [resolvable:$true] %s48_s12 }
  0x27   :  { %s733_s15 = scalar_lea.hbm %s1074_s0, 512 }
  0x28   :  { %p734_p2 = scmp.ne.s32.totalorder %s1074_s0, %s733_s15  ;;  %p737_p3 = scmp.lt.u32.totalorder %s733_s15, %s1074_s0 }
  0x2a   :  { %p739_p4 = pnand %p737_p3, %p734_p2 }
  0x2c   :  { %742 = shalt.err (!%p739_p4)
}
  0x2d   :  { %s743_s3 = scalar_lea.vmem %s25_s10, 512  ;;  %p748_p6 = scmp.lt.s32.totalorder %s25_s10, %s25_s10 }
  0x2e   :  { %p744_p5 = scmp.ne.s32.totalorder %s25_s10, %s743_s3  ;;  %p749_p7 = scmp.lt.s32.totalorder %s743_s3, %s743_s3 }
  0x30   :  { %p750_p8 = por %p749_p7, %p748_p6 }
  0x32   :  { %p751_p9 = pnand %p750_p8, %p744_p5 }
  0x34   :  { %754 = shalt.err (!%p751_p9)
}
  0x35   :  { %30 = dma.hbm_to_vmem [thread:$0]  %s1074_s0, 512, %s25_s10, [#allocation3], %s855_s17, %s855_s17, %s856_s18  }
  0x36   :  { %s755_s25 = scalar_lea.hbm %s1076_s2, 512 }
  0x37   :  { %p756_p10 = scmp.ne.s32.totalorder %s1076_s2, %s755_s25  ;;  %p759_p11 = scmp.lt.u32.totalorder %s755_s25, %s1076_s2 }
  0x39   :  { %p761_p12 = pnand %p759_p11, %p756_p10 }
  0x3b   :  { %764 = shalt.err (!%p761_p12)
}
  0x3c   :  { %s765_s28 = scalar_lea.vmem %s946_s12, 512  ;;  %p770_p0 = scmp.lt.s32.totalorder %s946_s12, %s946_s12 }
  0x3d   :  { %p766_p13 = scmp.ne.s32.totalorder %s946_s12, %s765_s28  ;;  %p771_p1 = scmp.lt.s32.totalorder %s765_s28, %s765_s28 }
  0x3f   :  { %p772_p2 = por %p771_p1, %p770_p0 }
  0x41   :  { %p773_p3 = pnand %p772_p2, %p766_p13 }
  0x43   :  { %776 = shalt.err (!%p773_p3)
}
  0x44   :  { %54 = dma.hbm_to_vmem [thread:$0]  %s1076_s2, 512, %s946_s12, [#allocation6], %s855_s17, %s855_s17, %s856_s18  }
  0x45   :  { %s859_s10 = smov [#allocation10]   ;;  %s777_s15 = scalar_lea.hbm %s1079_s5, 1024 }
  0x46   :  { %s74_s11 = sshll.u32 %s859_s10, 4  ;;  %p778_p4 = scmp.ne.s32.totalorder %s1079_s5, %s777_s15  ;;  %s75_s11 = int_to_ptr.vmem [resolvable:$true] %s74_s11 }
  0x47   :  { %p781_p5 = scmp.lt.u32.totalorder %s777_s15, %s1079_s5 }
  0x49   :  { %p783_p6 = pnand %p781_p5, %p778_p4 }
  0x4b   :  { %786 = shalt.err (!%p783_p6)
}
  0x4c   :  { %s787_s3 = scalar_lea.vmem %s75_s11, 1024  ;;  %p792_p8 = scmp.lt.s32.totalorder %s75_s11, %s75_s11 }
  0x4d   :  { %p788_p7 = scmp.ne.s32.totalorder %s75_s11, %s787_s3  ;;  %p793_p9 = scmp.lt.s32.totalorder %s787_s3, %s787_s3 }
  0x4f   :  { %p794_p10 = por %p793_p9, %p792_p8 }
  0x51   :  { %p795_p11 = pnand %p794_p10, %p788_p7 }
  0x53   :  { %798 = shalt.err (!%p795_p11)
}
  0x54   :  { %80 = dma.hbm_to_vmem [thread:$0]  %s1079_s5, 1024, %s75_s11, [#allocation9], %s855_s17, %s855_s17, %s856_s18  }
  0x55   :  { %843 = dma.done.wait [#allocation3], 512  }
  0x56   :  { %844 = vsyncadd [#allocation3], 4294966784 }
  0x57   :  { %845 = dma.done.wait [#allocation6], 1024  }
  0x58   :  { %846 = vsyncadd [#allocation6], 4294966272 }
  0x59   :  { %847 = dma.done.wait [#allocation9], 1536  }
  0x5a   :  { %848 = vsyncadd [#allocation9], 4294965760  ;;  %vm114_vm0 = vcmask 261120   ;;  %v110_v0 = vld [vmem:[#allocation8] sm:$0xff]  ;;  %v111_v1 = vld [vmem:[#allocation8 + $0x8] sm:$0xff]  ;;  %s860_s5 = smov 32  }
  0x5b   :  { %v112_v2 = vld [vmem:[#allocation8 + $0x10] sm:$0xff]  ;;  %v632_v3 = vpack.c.bf16 %v111_v1, %v110_v0  ;;  %v113_v4 = vld [vmem:[#allocation8 + $0x18] sm:$0xff]  ;;  %v102_v5 = vld [vmem:[#allocation5] sm:$0xff]  ;;  %vm339_vm1 = vcmask 523264   ;;  %vm496_vm2 = vcmask 523520   ;;  %s862_s23 = smov 96  }
  0x5c   :  { %v636_v6 = vpack.c.bf16 %v113_v4, %v112_v2  ;;  %590 = vmatprep.mubr.msk.f32.mxu0 %vm114_vm0, %v102_v5  ;;  %v106_v7 = vld [vmem:[#allocation7] sm:$0xff]  ;;  %v107_v8 = vld [vmem:[#allocation7 + $0x8] sm:$0xff]  ;;  %v108_v10 = vld [vmem:[#allocation7 + $0x10] sm:$0xff]  ;;  %480 = vrot.lane.b32.xlu0 %v102_v5, %s860_s5 }
  0x5d   :  { %633 = vmatprep.subr.bf16.mxu0 %v632_v3  ;;  %v640_v9 = vpack.c.bf16 %v107_v8, %v106_v7  ;;  %v324_v11 = vld [vmem:[#allocation10] sm:$0xff]  ;;  %v325_v12 = vld [vmem:[#allocation10 + $0x8] sm:$0xff]  ;;  %v109_v13 = vld [vmem:[#allocation7 + $0x18] sm:$0xff] }
  0x5e   :  { %635 = vmatpush3.bf16.msra.mxu0 %v632_v3  ;;  %v648_v14 = vpack.c.bf16 %v325_v12, %v324_v11  ;;  %v326_v15 = vld [vmem:[#allocation10 + $0x10] sm:$0xff]  ;;  %v327_v16 = vld [vmem:[#allocation10 + $0x18] sm:$0xff]  ;;  %v328_v18 = vld [vmem:[#allocation10 + $0x20] sm:$0xff]  ;;  %v644_v22 = vpack.c.bf16 %v109_v13, %v108_v10 }
  0x5f   :  { %637 = vmatprep.subr.bf16.mxu0 %v636_v6  ;;  %v652_v17 = vpack.c.bf16 %v327_v16, %v326_v15  ;;  %v329_v19 = vld [vmem:[#allocation10 + $0x28] sm:$0xff]  ;;  %v104_v21 = vld [vmem:[#allocation5 + $0x10] sm:$0xff]  ;;  %v105_v24 = vld [vmem:[#allocation5 + $0x18] sm:$0xff] }
  0x60   :  { %v103_v20 = vld [vmem:[#allocation5 + $0x8] sm:$0xff]  ;;  %649 = vmatprep.subr.bf16.mxu1 %v648_v14  ;;  %v656_v23 = vpack.c.bf16 %v329_v19, %v328_v18  ;;  %v1001_v25 = vld [vmem:[#allocation2] sm:$0xff]  ;;  %v1008_v27 = vld [vmem:[#allocation2 + $0x10] sm:$0xff]  ;;  %484 = vrot.lane.b32.xlu1 %v104_v21, %s860_s5 }
  0x61   :  { %651 = vmatpush3.bf16.msra.mxu1 %v648_v14  ;;  %v1006_v26 = vld [vmem:[#allocation2 + $0x8] sm:$0xff]  ;;  %v1014_v28 = vld [vmem:[#allocation2 + $0x18] sm:$0xff]  ;;  %v330_v29 = vld [vmem:[#allocation10 + $0x30] sm:$0xff]  ;;  %482 = vrot.lane.b32.xlu0 %v103_v20, %s860_s5 }
  0x62   :  { %639 = vmatpush3.bf16.msra.mxu0 %v636_v6  ;;  %653 = vmatprep.subr.bf16.mxu1 %v652_v17  ;;  %v331_v30 = vld [vmem:[#allocation10 + $0x38] sm:$0xff]  ;;  %v548_v32 = vld [vmem:[%s1078_s4] ss:$0 sm:$0xff] }
  0x63   :  { %641 = vmatprep.subr.bf16.mxu0 %v640_v9  ;;  %v660_v31 = vpack.c.bf16 %v331_v30, %v330_v29  ;;  %v549_v45 = vld [vmem:[%s1080_s6] ss:$0 sm:$0xff]  ;;  %s861_s6 = smov [#allocation11]  }
  0x64   :  { %486 = vrot.lane.b32.xlu1 %v105_v24, %s860_s5  ;;  %s515_s22 = sshll.u32 %s861_s6, 4  ;;  %s516_s22 = int_to_ptr.vmem [resolvable:$true] %s515_s22 }
  0x65   :  { %591 = vmatmul.mubr.msk.f32.vlgmr.msra.gmra.mrb[0].mxu0 %vm114_vm0, %v103_v20  ;;  %655 = vmatpush3.bf16.msra.mxu1 %v652_v17  ;;  %s799_s24 = scalar_lea.vmem %s516_s22, 128  ;;  %p804_p13 = scmp.lt.s32.totalorder %s516_s22, %s516_s22 }
  0x66   :  { %643 = vmatpush3.bf16.msra.mxu0 %v640_v9  ;;  %593 = vmatprep.mubr.msk.f32.mxu0 %vm114_vm0, %v104_v21  ;;  %p800_p12 = scmp.ne.s32.totalorder %s516_s22, %s799_s24  ;;  %p805_p0 = scmp.lt.s32.totalorder %s799_s24, %s799_s24 }
  0x67   :  { %645 = vmatprep.subr.bf16.mxu0 %v644_v22  ;;  %657 = vmatprep.subr.bf16.mxu1 %v656_v23 }
  0x68   :  { %p806_p1 = por %p805_p0, %p804_p13 }
  0x69   :  { %594 = vmatmul.mubr.msk.f32.gmra.mrb[2].mxu0 %vm114_vm0, %v105_v24  ;;  %659 = vmatpush3.bf16.msra.mxu1 %v656_v23 }
  0x6a   :  { %647 = vmatpush3.bf16.msra.mxu0 %v644_v22  ;;  %604 = vmatprep.mubr.msk.f32.mxu0 %vm114_vm0, %v1001_v25  ;;  %p807_p2 = pnand %p806_p1, %p800_p12 }
  0x6b   :  { %661 = vmatprep.subr.bf16.mxu1 %v660_v31 }
  0x6d   :  { %605 = vmatmul.mubr.msk.f32.vlgmr.msra.gmra.mrb[0].mxu0 %vm114_vm0, %v1006_v26  ;;  %663 = vmatpush3.bf16.msra.mxu1 %v660_v31 }
  0x6e   :  { %607 = vmatprep.mubr.msk.f32.mxu0 %vm114_vm0, %v1008_v27 }
  0x71   :  { %608 = vmatmul.mubr.msk.f32.gmra.mrb[2].mxu0 %vm114_vm0, %v1014_v28 }
  0xce   :  { %v481_v16 = vpop.permute.xlu0 %480 }
  0xd2   :  { %v485_v17 = vpop.permute.xlu1 %484 }
  0xd3   :  { %v483_v22 = vpop.permute.xlu0 %482 }
  0xd6   :  { %v487_v30 = vpop.permute.xlu1 %486 }
 0x140   :  { %v606_v33 = vpop.f32.mrb[0].mxu0 }
 0x141   :  { %v317_v34 = vadd.f32 %v606_v33, %v548_v32  ;;  %v290_v35 = vpop.f32.mrb[1].mxu0 }
 0x142   :  { %v316_v36 = vadd.f32 %v548_v32, %v290_v35 }
 0x143   :  { %v321_v39 = vmax.f32 %v317_v34, 0.0 }
 0x144   :  { %v320_v37 = vmax.f32 %v316_v36, 0.0  ;;  %v609_v38 = vpop.f32.mrb[2].mxu0 }
 0x145   :  { %v319_v40 = vadd.f32 %v609_v38, %v548_v32  ;;  %v300_v41 = vpop.f32.mrb[3].mxu0 }
 0x146   :  { %v318_v42 = vadd.f32 %v548_v32, %v300_v41  ;;  %626 = vmatprep.mubr.msk.f32.mxu1 %vm339_vm1, %v320_v37 }
 0x147   :  { %627 = vmatmul.mubr.msk.f32.vlgmr.msra.gmra.mrb[0].mxu1 %vm339_vm1, %v321_v39  ;;  %v323_v44 = vmax.f32 %v319_v40, 0.0 }
 0x148   :  { %v322_v43 = vmax.f32 %v318_v42, 0.0 }
 0x14a   :  { %629 = vmatprep.mubr.msk.f32.mxu1 %vm339_vm1, %v322_v43 }
 0x14b   :  { %630 = vmatmul.mubr.msk.f32.gmra.mrb[2].mxu1 %vm339_vm1, %v323_v44 }
 0x21a   :  { %v628_v46 = vpop.f32.mrb[0].mxu1 }
 0x21b   :  { %v424_v47 = vadd.f32 %v628_v46, %v549_v45  ;;  %v418_v48 = vpop.f32.mrb[1].mxu1 }
 0x21c   :  { %v419_v49 = vadd.f32 %v549_v45, %v418_v48 }
 0x21d   :  { %v438_v50 = vsel %vm339_vm1, %v424_v47, -inf }
 0x21e   :  { %v437_v51 = vsel %vm339_vm1, %v419_v49, -inf  ;;  %v631_v52 = vpop.f32.mrb[2].mxu1 }
 0x21f   :  { %v441_v53 = vmax.f32 %v437_v51, %v438_v50  ;;  %v434_v54 = vadd.f32 %v631_v52, %v549_v45  ;;  %v428_v55 = vpop.f32.mrb[3].mxu1 }
 0x220   :  { %v429_v56 = vadd.f32 %v549_v45, %v428_v55 }
 0x221   :  { %v440_v57 = vsel %vm339_vm1, %v434_v54, -inf }
 0x222   :  { %v439_v58 = vsel %vm339_vm1, %v429_v56, -inf }
 0x223   :  { %v442_v59 = vmax.f32 %v439_v58, %v440_v57 }
 0x225   :  { %v443_v60 = vmax.f32 %v441_v53, %v442_v59 }
 0x227   :  { %v444_v61 = vsub.f32 %v419_v49, %v443_v60  ;;  %v445_v62 = vsub.f32 %v424_v47, %v443_v60  ;;  %v446_v63 = vsub.f32 %v429_v56, %v443_v60  ;;  %v447_v0 = vsub.f32 %v434_v54, %v443_v60 }
 0x229   :  { %v448_v1 = vmul.f32 1.442695, %v444_v61  ;;  %v450_v2 = vmul.f32 1.442695, %v445_v62  ;;  %v452_v3 = vmul.f32 1.442695, %v446_v63 }
 0x22a   :  { %v454_v4 = vmul.f32 1.442695, %v447_v0 }
 0x22b   :  { %679 = vpow2.f32 %v448_v1 }
 0x22c   :  { %681 = vpow2.f32 %v450_v2 }
 0x22d   :  { %683 = vpow2.f32 %v452_v3 }
 0x22e   :  { %685 = vpow2.f32 %v454_v4 }
 0x235   :  { %v680_v5 = vpop.eup %679 }
 0x236   :  { %v682_v6 = vpop.eup %681  ;;  %v456_v7 = vsel %vm339_vm1, %v680_v5, 0.0 }
 0x237   :  { %v684_v8 = vpop.eup %683  ;;  %v457_v9 = vsel %vm339_vm1, %v682_v6, 0.0 }
 0x238   :  { %v686_v10 = vpop.eup %685  ;;  %v458_v11 = vadd.f32 %v457_v9, %v456_v7  ;;  %v459_v12 = vsel %vm339_vm1, %v684_v8, 0.0 }
 0x239   :  { %v461_v14 = vsel %vm339_vm1, %v686_v10, 0.0 }
 0x23a   :  { %v460_v13 = vadd.f32 %v459_v12, %v458_v11 }
 0x23c   :  { %v462_v15 = vadd.f32 %v461_v14, %v460_v13 }
 0x23e   :  { %687 = vrcp.f32 %v462_v15 }
 0x248   :  { %v688_v18 = vpop.eup %687 }
 0x249   :  { %v466_v19 = vmul.f32 %v688_v18, %v684_v8  ;;  %v464_v20 = vmul.f32 %v688_v18, %v680_v5  ;;  %v467_v21 = vmul.f32 %v688_v18, %v686_v10  ;;  %v465_v23 = vmul.f32 %v688_v18, %v682_v6 }
 0x24b   :  { %v468_v24 = vmul.f32 %v464_v20, %v1001_v25  ;;  %v492_v29 = vmul.f32 %v481_v16, %v464_v20  ;;  %v470_v31 = vmul.f32 %v466_v19, %v1008_v27  ;;  %v494_v32 = vmul.f32 %v485_v17, %v466_v19 }
 0x24c   :  { %v469_v33 = vmul.f32 %v465_v23, %v1006_v26  ;;  %v493_v34 = vmul.f32 %v483_v22, %v465_v23  ;;  %v471_v37 = vmul.f32 %v467_v21, %v1014_v28  ;;  %v495_v38 = vmul.f32 %v487_v30, %v467_v21 }
 0x24d   :  { %v472_v35 = vsel %vm114_vm0, %v468_v24, 0.0  ;;  %v497_v36 = vsel %vm496_vm2, %v492_v29, 0.0  ;;  %v475_v42 = vsel %vm114_vm0, %v470_v31, 0.0  ;;  %v500_v27 = vsel %vm496_vm2, %v494_v32, 0.0 }
 0x24e   :  { %v473_v39 = vsel %vm114_vm0, %v469_v33, 0.0  ;;  %v498_v40 = vsel %vm496_vm2, %v493_v34, 0.0  ;;  %v477_v44 = vsel %vm114_vm0, %v471_v37, 0.0  ;;  %v502_v45 = vsel %vm496_vm2, %v495_v38, 0.0 }
 0x24f   :  { %v474_v25 = vadd.f32 %v473_v39, %v472_v35  ;;  %v499_v41 = vadd.f32 %v498_v40, %v497_v36 }
 0x251   :  { %v501_v26 = vadd.f32 %v500_v27, %v499_v41  ;;  %v476_v43 = vadd.f32 %v475_v42, %v474_v25 }
 0x253   :  { %v503_v28 = vadd.f32 %v502_v45, %v501_v26  ;;  %v478_v46 = vadd.f32 %v477_v44, %v476_v43 }
 0x255   :  { %505 = vrot.lane.b32.xlu0 %v503_v28, %s862_s23  ;;  %479 = vst.msk [vmem:[#allocation11] sm:$0xff] %vm114_vm0, %v478_v46 }
 0x256   :  { %810 = shalt.err (!%p807_p2)
}
 0x257   :  { %s811_s27 = scalar_lea.hbm %s1081_s7, 128 }
 0x258   :  { %p812_p3 = scmp.ne.s32.totalorder %s1081_s7, %s811_s27  ;;  %p815_p4 = scmp.lt.u32.totalorder %s811_s27, %s1081_s7 }
 0x25a   :  { %p817_p5 = pnand %p815_p4, %p812_p3 }
 0x25c   :  { %820 = shalt.err (!%p817_p5)
}
 0x25d   :  { %518 = dma.vmem_to_hbm [thread:$0]  %s516_s22, 128, %s1081_s7, [#allocation4]  }
 0x25e   :  { %s863_s11 = smov [#allocation12]  }
 0x25f   :  { %s525_s13 = sshll.u32 %s863_s11, 4  ;;  %s526_s13 = int_to_ptr.vmem [resolvable:$true] %s525_s13 }
 0x260   :  { %s821_s14 = scalar_lea.vmem %s526_s13, 128  ;;  %p826_p7 = scmp.lt.s32.totalorder %s526_s13, %s526_s13 }
 0x261   :  { %p822_p6 = scmp.ne.s32.totalorder %s526_s13, %s821_s14  ;;  %p827_p8 = scmp.lt.s32.totalorder %s821_s14, %s821_s14 }
 0x263   :  { %p828_p9 = por %p827_p8, %p826_p7 }
 0x265   :  { %p829_p10 = pnand %p828_p9, %p822_p6 }
 0x2c7   :  { %v506_v47 = vpop.permute.xlu0 %505 }
 0x2c8   :  { %508 = vst.msk [vmem:[#allocation12] sm:$0xff] %vm114_vm0, %v506_v47 }
 0x2c9   :  { %832 = shalt.err (!%p829_p10)
}
 0x2ca   :  { %s833_s19 = scalar_lea.hbm %s1082_s8, 128 }
 0x2cb   :  { %p834_p11 = scmp.ne.s32.totalorder %s1082_s8, %s833_s19  ;;  %p837_p12 = scmp.lt.u32.totalorder %s833_s19, %s1082_s8 }
 0x2cd   :  { %p839_p13 = pnand %p837_p12, %p834_p11 }
 0x2cf   :  { %842 = shalt.err (!%p839_p13)
}
 0x2d0   :  { %528 = dma.vmem_to_hbm [thread:$0]  %s526_s13, 128, %s1082_s8, [#allocation13]  }
 0x2d1   :  { %849 = dma.done.wait [#allocation4], 128  }
 0x2d2   :  { %850 = vsyncadd [#allocation4], 4294967168 }
 0x2d3   :  { %851 = dma.done.wait [#allocation13], 128  }
 0x2d4   :  { %852 = vsyncadd [#allocation13], 4294967168 }
 0x2d5   :  { %535 = vsyncpa [#allocation3], 1 }
 0x2d6   :  { %536 = vsyncpa [#allocation6], 1 }
 0x2d7   :  { %537 = vsyncpa [#allocation9], 1 }
 0x2d8   :  { %538 = vsyncpa [#allocation4], 1 }
 0x2d9   :  { %539 = vsyncpa [#allocation13], 1 }

</bundles_post_ra>
